<compile_context>
chip_gen: v5e
topology: v5e:2x2
jax: 0.10.0
libtpu: 0.0.40
codegen_flags: <defaults>
</compile_context>

<pallas_src>
import jax
import jax.numpy as jnp
from jax.experimental import pallas as pl
from jax.experimental.pallas import tpu as pltpu

# Static problem sizes implied by the module.
INPUT_SIZE = 2
HIDDEN_SIZE = 2
NUM_GATES = 4          # PyTorch LSTM gate order [i, f, g, o]
CHUNK_ROWS = 8         # sublane-aligned stride of each packed parameter chunk
LANES = 128            # lane-dense padding for slab and output
OUT_ROWS = 8           # sublane-aligned padded output rows (>= T)


def lstm_seq_kernel(x_smem, slab_ref, out_ref):
    """Runs the whole (short) LSTM sequence in one kernel invocation.

    x_smem:   (T*I,) f32 in SMEM  -- flattened input sequence (scalar reads).
    slab_ref: (CHUNK_ROWS*(I+H+1), LANES) f32 in VMEM -- packed params; chunk c
              occupies rows [8c, 8c+4), lanes [0, H):
                chunks 0..I-1   : W_ih^T slice for input feature k
                chunks I..I+H-1 : W_hh^T slice for hidden unit k
                chunk  I+H      : bias (b_ih + b_hh)
    out_ref:  (OUT_ROWS, LANES) f32 in VMEM -- rows 0:T hold h_t (lanes 0:H
              live); single unmasked full-tile store.
    """
    I = INPUT_SIZE
    H = HIDDEN_SIZE
    G = NUM_GATES
    T = x_smem.shape[0] // I

    def chunk(idx):
        r0 = idx * CHUNK_ROWS
        return slab_ref[r0:r0 + G, :]                 # (G, LANES), tile-aligned

    wih = [chunk(k) for k in range(I)]                # I x (G, LANES)
    whh = [chunk(I + k) for k in range(H)]            # H x (G, LANES)
    bias = chunk(I + H)                               # (G, LANES)

    # Hoisted input projection (NOT on the recurrence critical path):
    #   gx[t] = bias + sum_i x[t, i] * W_ih^T[i]     (scalar * vreg FMA)
    gx = []
    for t in range(T):
        acc = bias
        for i in range(I):
            acc = acc + x_smem[t * I + i] * wih[i]
        gx.append(acc)

    h = jnp.zeros((1, LANES), dtype=jnp.float32)
    c = jnp.zeros((1, LANES), dtype=jnp.float32)
    hs = []
    # T is tiny and static -> fully unrolled Python loop (traced once).
    for t in range(T):
        # Recurrent projection as broadcast-multiply-add over the H hidden
        # units (pure VPU; no MXU round-trip per step).
        gates = gx[t]
        for k in range(H):
            gates = gates + h[:, k:k + 1] * whh[k]    # (G, LANES)

        # Two full-vector EUP passes instead of four per-gate slices.
        sig = jax.nn.sigmoid(gates)                   # (G, LANES)
        tnh = jnp.tanh(gates)                         # (G, LANES)
        i_g = sig[0:1, :]
        f_g = sig[1:2, :]
        g_g = tnh[2:3, :]
        o_g = sig[3:4, :]

        c = f_g * c + i_g * g_g
        h = o_g * jnp.tanh(c)
        hs.append(h)

    # Pad to a full sublane-aligned tile and do one unmasked contiguous store.
    pad = jnp.zeros((OUT_ROWS - T, LANES), dtype=jnp.float32)
    out_ref[...] = jnp.concatenate(hs + [pad], axis=0).astype(out_ref.dtype)


def pack_params(w_ih, w_hh, b_ih, b_hh):
    """Pack all LSTM parameters into ONE lane-dense, sublane-aligned f32 slab.

    Called once at weight-load time (outside the per-call forward path).

    PyTorch layout: w_ih (4H, I), w_hh (4H, H), biases (4H,), gate-major rows.
    Packed layout: one CHUNK_ROWS-row, LANES-wide chunk per "source" (each
    input feature, each hidden unit, plus bias); the (4, H) block = (gate,
    hidden) sits in rows 0:4, lanes 0:H of its chunk, zeros elsewhere.
    """
    G = NUM_GATES
    H = w_hh.shape[1]
    I = w_ih.shape[1]
    w_ih = w_ih.astype(jnp.float32)
    w_hh = w_hh.astype(jnp.float32)
    bias = (b_ih + b_hh).astype(jnp.float32)

    wih_k = jnp.transpose(w_ih.reshape(G, H, I), (2, 0, 1))    # (I, G, H)
    whh_k = jnp.transpose(w_hh.reshape(G, H, H), (2, 0, 1))    # (H, G, H)
    bias_g = bias.reshape(1, G, H)                             # (1, G, H)
    chunks = jnp.concatenate([wih_k, whh_k, bias_g], axis=0)   # (I+H+1, G, H)

    n_chunks = chunks.shape[0]
    slab = jnp.zeros((n_chunks, CHUNK_ROWS, LANES), jnp.float32)
    slab = slab.at[:, :G, :H].set(chunks)
    return slab.reshape(n_chunks * CHUNK_ROWS, LANES)          # (8*(I+H+1), 128)


@jax.jit
def lstm_forward(x, slab):
    """x: (B, T, I) with B == 1; slab: pre-packed params.  Returns (T, H)."""
    B, T, I = x.shape
    assert B == 1 and I == INPUT_SIZE
    assert T <= OUT_ROWS

    x_flat = x.reshape(T * I).astype(jnp.float32)              # tiny -> SMEM

    out_padded = pl.pallas_call(
        lstm_seq_kernel,
        out_shape=jax.ShapeDtypeStruct((OUT_ROWS, LANES), jnp.float32),
        in_specs=[
            pl.BlockSpec(memory_space=pltpu.MemorySpace.SMEM),  # x scalars
            pl.BlockSpec(memory_space=pltpu.MemorySpace.VMEM),  # packed params
        ],
        out_specs=pl.BlockSpec(memory_space=pltpu.MemorySpace.VMEM),
    )(x_flat, slab)
    return out_padded[:T, :HIDDEN_SIZE]


def model_forward(x1, slab):
    """Mirrors Model.forward: unsqueeze + LSTM(zero init) + x3[0][0].

    x3[0] is the LSTM output (batch, seq, hidden); [0] selects batch element 0,
    so the returned value has shape (seq, hidden) = (2, 2).
    """
    return lstm_forward(x1, slab)


def _lstm_ref(x, w_ih, w_hh, b_ih, b_hh):
    """Pure-JAX reference (PyTorch LSTMCell semantics) for correctness check."""
    B, T, I = x.shape
    H = w_hh.shape[1]
    h = jnp.zeros((B, H), jnp.float32)
    c = jnp.zeros((B, H), jnp.float32)
    outs = []
    for t in range(T):
        gates = x[:, t, :] @ w_ih.T + h @ w_hh.T + b_ih + b_hh
        i_g = jax.nn.sigmoid(gates[:, 0:H])
        f_g = jax.nn.sigmoid(gates[:, H:2 * H])
        g_g = jnp.tanh(gates[:, 2 * H:3 * H])
        o_g = jax.nn.sigmoid(gates[:, 3 * H:4 * H])
        c = f_g * c + i_g * g_g
        h = o_g * jnp.tanh(c)
        outs.append(h)
    return jnp.stack(outs, axis=1)[0]                           # (T, H)


def init_params(key, input_size=2, hidden_size=2):
    """Deterministic LSTMCell params, PyTorch-style uniform(-1/sqrt(H), 1/sqrt(H))."""
    k1, k2, k3, k4 = jax.random.split(key, 4)
    bound = 1.0 / jnp.sqrt(jnp.float32(hidden_size))
    w_ih = jax.random.uniform(k1, (4 * hidden_size, input_size), jnp.float32, -bound, bound)
    w_hh = jax.random.uniform(k2, (4 * hidden_size, hidden_size), jnp.float32, -bound, bound)
    b_ih = jax.random.uniform(k3, (4 * hidden_size,), jnp.float32, -bound, bound)
    b_hh = jax.random.uniform(k4, (4 * hidden_size,), jnp.float32, -bound, bound)
    return w_ih, w_hh, b_ih, b_hh


if __name__ == "__main__":
    key = jax.random.PRNGKey(0)
    k_x, k_p = jax.random.split(key)

    # x1 = torch.randn(1, 2, 2)  -> (batch=1, seq=2, input=2)
    x1 = jax.random.normal(k_x, (1, 2, 2), dtype=jnp.float32)
    w_ih, w_hh, b_ih, b_hh = init_params(k_p, input_size=INPUT_SIZE, hidden_size=HIDDEN_SIZE)

    # Pack once at weight-load time (not per call).
    slab = jax.block_until_ready(pack_params(w_ih, w_hh, b_ih, b_hh))

    out = model_forward(x1, slab)
    jax.block_until_ready(out)

    assert out.shape == (2, 2), out.shape
    assert bool(jnp.all(jnp.isfinite(out)))

    ref = _lstm_ref(x1, w_ih, w_hh, b_ih, b_hh)
    assert bool(jnp.allclose(out, ref, atol=1e-5, rtol=1e-4)), (out, ref)

    print("KERNEL_OK")
</pallas_src>

<mosaic_0001>
module attributes {stable_mosaic.version = 11 : i64} {
  func.func @lstm_seq_kernel(%arg0: memref<4xf32, #tpu.memory_space<smem>>, %arg1: memref<40x128xf32, #tpu.memory_space<vmem>>, %arg2: memref<8x128xf32, #tpu.memory_space<vmem>>) attributes {dimension_semantics = [], scalar_prefetch = 0 : i64, scratch_operands = 0 : i64, tpu.core_type = #tpu.core_type<tc>} {
    %c0 = arith.constant 0 : index
    %c0_0 = arith.constant 0 : index
    %0 = vector.load %arg1[%c0, %c0_0] : memref<40x128xf32, #tpu.memory_space<vmem>>, vector<4x128xf32>
    %c8 = arith.constant 8 : index
    %c0_1 = arith.constant 0 : index
    %1 = vector.load %arg1[%c8, %c0_1] : memref<40x128xf32, #tpu.memory_space<vmem>>, vector<4x128xf32>
    %c16 = arith.constant 16 : index
    %c0_2 = arith.constant 0 : index
    %2 = vector.load %arg1[%c16, %c0_2] : memref<40x128xf32, #tpu.memory_space<vmem>>, vector<4x128xf32>
    %c24 = arith.constant 24 : index
    %c0_3 = arith.constant 0 : index
    %3 = vector.load %arg1[%c24, %c0_3] : memref<40x128xf32, #tpu.memory_space<vmem>>, vector<4x128xf32>
    %c32 = arith.constant 32 : index
    %c0_4 = arith.constant 0 : index
    %4 = vector.load %arg1[%c32, %c0_4] : memref<40x128xf32, #tpu.memory_space<vmem>>, vector<4x128xf32>
    %c0_5 = arith.constant 0 : index
    %5 = memref.load %arg0[%c0_5] : memref<4xf32, #tpu.memory_space<smem>>
    %6 = vector.broadcast %5 : f32 to vector<4x128xf32>
    %7 = arith.mulf %6, %0 : vector<4x128xf32>
    %8 = arith.addf %4, %7 : vector<4x128xf32>
    %c1 = arith.constant 1 : index
    %9 = memref.load %arg0[%c1] : memref<4xf32, #tpu.memory_space<smem>>
    %10 = vector.broadcast %9 : f32 to vector<4x128xf32>
    %11 = arith.mulf %10, %1 : vector<4x128xf32>
    %12 = arith.addf %8, %11 : vector<4x128xf32>
    %c2 = arith.constant 2 : index
    %13 = memref.load %arg0[%c2] : memref<4xf32, #tpu.memory_space<smem>>
    %14 = vector.broadcast %13 : f32 to vector<4x128xf32>
    %15 = arith.mulf %14, %0 : vector<4x128xf32>
    %16 = arith.addf %4, %15 : vector<4x128xf32>
    %c3 = arith.constant 3 : index
    %17 = memref.load %arg0[%c3] : memref<4xf32, #tpu.memory_space<smem>>
    %18 = vector.broadcast %17 : f32 to vector<4x128xf32>
    %19 = arith.mulf %18, %1 : vector<4x128xf32>
    %20 = arith.addf %16, %19 : vector<4x128xf32>
    %cst = arith.constant 0.000000e+00 : f32
    %21 = vector.broadcast %cst : f32 to vector<1x128xf32>
    %cst_6 = arith.constant 0.000000e+00 : f32
    %22 = vector.broadcast %cst_6 : f32 to vector<1x128xf32>
    %23 = vector.extract_strided_slice %21 {offsets = [0, 0], sizes = [1, 1], strides = [1, 1]} : vector<1x128xf32> to vector<1x1xf32>
    %24 = vector.broadcast %23 : vector<1x1xf32> to vector<4x128xf32>
    %25 = arith.mulf %24, %2 : vector<4x128xf32>
    %26 = arith.addf %12, %25 : vector<4x128xf32>
    %27 = vector.extract_strided_slice %21 {offsets = [0, 1], sizes = [1, 1], strides = [1, 1]} : vector<1x128xf32> to vector<1x1xf32>
    %28 = vector.broadcast %27 : vector<1x1xf32> to vector<4x128xf32>
    %29 = arith.mulf %28, %3 : vector<4x128xf32>
    %30 = arith.addf %26, %29 : vector<4x128xf32>
    %31 = arith.negf %30 : vector<4x128xf32>
    %32 = math.exp %31 : vector<4x128xf32>
    %cst_7 = arith.constant 1.000000e+00 : f32
    %33 = vector.broadcast %cst_7 : f32 to vector<4x128xf32>
    %34 = arith.addf %33, %32 : vector<4x128xf32>
    %35 = arith.divf %33, %34 : vector<4x128xf32>
    %36 = math.tanh %30 : vector<4x128xf32>
    %37 = vector.extract_strided_slice %35 {offsets = [0, 0], sizes = [1, 128], strides = [1, 1]} : vector<4x128xf32> to vector<1x128xf32>
    %38 = vector.extract_strided_slice %35 {offsets = [1, 0], sizes = [1, 128], strides = [1, 1]} : vector<4x128xf32> to vector<1x128xf32>
    %39 = vector.extract_strided_slice %36 {offsets = [2, 0], sizes = [1, 128], strides = [1, 1]} : vector<4x128xf32> to vector<1x128xf32>
    %40 = vector.extract_strided_slice %35 {offsets = [3, 0], sizes = [1, 128], strides = [1, 1]} : vector<4x128xf32> to vector<1x128xf32>
    %41 = arith.mulf %38, %22 : vector<1x128xf32>
    %42 = arith.mulf %37, %39 : vector<1x128xf32>
    %43 = arith.addf %41, %42 : vector<1x128xf32>
    %44 = math.tanh %43 : vector<1x128xf32>
    %45 = arith.mulf %40, %44 : vector<1x128xf32>
    %46 = vector.extract_strided_slice %45 {offsets = [0, 0], sizes = [1, 1], strides = [1, 1]} : vector<1x128xf32> to vector<1x1xf32>
    %47 = vector.broadcast %46 : vector<1x1xf32> to vector<4x128xf32>
    %48 = arith.mulf %47, %2 : vector<4x128xf32>
    %49 = arith.addf %20, %48 : vector<4x128xf32>
    %50 = vector.extract_strided_slice %45 {offsets = [0, 1], sizes = [1, 1], strides = [1, 1]} : vector<1x128xf32> to vector<1x1xf32>
    %51 = vector.broadcast %50 : vector<1x1xf32> to vector<4x128xf32>
    %52 = arith.mulf %51, %3 : vector<4x128xf32>
    %53 = arith.addf %49, %52 : vector<4x128xf32>
    %54 = arith.negf %53 : vector<4x128xf32>
    %55 = math.exp %54 : vector<4x128xf32>
    %cst_8 = arith.constant 1.000000e+00 : f32
    %56 = vector.broadcast %cst_8 : f32 to vector<4x128xf32>
    %57 = arith.addf %56, %55 : vector<4x128xf32>
    %58 = arith.divf %56, %57 : vector<4x128xf32>
    %59 = math.tanh %53 : vector<4x128xf32>
    %60 = vector.extract_strided_slice %58 {offsets = [0, 0], sizes = [1, 128], strides = [1, 1]} : vector<4x128xf32> to vector<1x128xf32>
    %61 = vector.extract_strided_slice %58 {offsets = [1, 0], sizes = [1, 128], strides = [1, 1]} : vector<4x128xf32> to vector<1x128xf32>
    %62 = vector.extract_strided_slice %59 {offsets = [2, 0], sizes = [1, 128], strides = [1, 1]} : vector<4x128xf32> to vector<1x128xf32>
    %63 = vector.extract_strided_slice %58 {offsets = [3, 0], sizes = [1, 128], strides = [1, 1]} : vector<4x128xf32> to vector<1x128xf32>
    %64 = arith.mulf %61, %43 : vector<1x128xf32>
    %65 = arith.mulf %60, %62 : vector<1x128xf32>
    %66 = arith.addf %64, %65 : vector<1x128xf32>
    %67 = math.tanh %66 : vector<1x128xf32>
    %68 = arith.mulf %63, %67 : vector<1x128xf32>
    %cst_9 = arith.constant 0.000000e+00 : f32
    %69 = vector.broadcast %cst_9 : f32 to vector<6x128xf32>
    %70 = tpu.concatenate %45, %68, %69 in 0 : vector<1x128xf32>, vector<1x128xf32>, vector<6x128xf32> -> vector<8x128xf32>
    %c0_10 = arith.constant 0 : index
    %c0_11 = arith.constant 0 : index
    %71 = vector.load %arg2[%c0_10, %c0_11] : memref<8x128xf32, #tpu.memory_space<vmem>>, vector<8x128xf32>
    tpu.vector_store %arg2[%c0_10, %c0_11], %70 {strides = array<i32>} : memref<8x128xf32, #tpu.memory_space<vmem>>, vector<8x128xf32>,
    return
  }
}

</mosaic_0001>

<bundles_post_ra>
// kernel: lstm_forward.1
= control target key start
LH: loop header
LB: loop body
LE: loop exit
PB: predicated region body
PF: predicated region fallthrough
CT: control target
= control target key end

     0   :  { %7 = vsyncpa [#allocation4], 0  ;;  %s261_s0 = inlined_call_operand.vmem [shape: f32[4], index: 0, kind: input, shape index: {}]   ;;  %s262_s1 = inlined_call_operand.hbm [shape: f32[40,128], index: 1, kind: input, shape index: {}]   ;;  %s263_s2 = inlined_call_operand.vmem [shape: f32[8,128], index: 2, kind: output, shape index: {}]  }
   0x1   :  { %s14_s11 = sshll.u32 %s261_s0, 4  ;;  %s15_s11 = int_to_ptr.vmem [resolvable:$true] %s14_s11 }
   0x2   :  { %8 = vsyncpa [#allocation3], 0  ;;  %s22_s14 = sshll.u32 %s262_s1, 4  ;;  %s232_s15 = smov [#allocation2]   ;;  %s23_s14 = int_to_ptr.hbm [resolvable:$true] %s22_s14 }
   0x3   :  { %17 = dma.vmem_to_smem %s15_s11, 16, %s232_s15, [#allocation4]  }
   0x4   :  { %s233_s16 = smov [#allocation5]   ;;  %s234_s18 = smov 128  }
   0x5   :  { %s24_s17 = sshll.u32 %s233_s16, 4  ;;  %s235_s19 = smov 8   ;;  %s25_s17 = int_to_ptr.vmem [resolvable:$true] %s24_s17 }
   0x6   :  { %30 = dma.hbm_to_vmem [thread:$0]  %s23_s14, 640, %s25_s17, [#allocation3], %s234_s18, %s234_s18, %s235_s19  }
   0x7   :  { %228 = dma.done.wait [#allocation4], 16  }
   0x8   :  { %229 = vsyncadd [#allocation4], 4294967280 }
   0x9   :  { %230 = dma.done.wait [#allocation3], 640  }
   0xa   :  { %231 = vsyncadd [#allocation3], 4294966656 }
   0xb   :  { %39 = sfence }
   0xc   :  { %s45_s0 = sld [smem:[#allocation2]]  ;;  %v40_v0 = vld [vmem:[#allocation5] sm:$0xf]  ;;  %v41_v1 = vld [vmem:[#allocation5 + $0x8] sm:$0xf]  ;;  %s236_s1 = smov 127  }
   0xd   :  { %s162_s20 = sld [smem:[#allocation2 + $0x1]]  ;;  %v42_v2 = vld [vmem:[#allocation5 + $0x10] sm:$0xf]  ;;  %v44_v3 = vld [vmem:[#allocation5 + $0x20] sm:$0xf]  ;;  %vm151_vm8 = vcmask 1040384  }
   0xe   :  { %v43_v7 = vld [vmem:[#allocation5 + $0x18] sm:$0xf]  ;;  %v61_v10 = vmul.f32 0.0, %v42_v2  ;;  %s163_s21 = sld [smem:[#allocation2 + $0x2]]  ;;  %vm153_vm9 = vcmask 1041408  }
   0xf   :  { %v63_v12 = vmul.f32 0.0, %v43_v7  ;;  %s164_s22 = sld [smem:[#allocation2 + $0x3]] }
  0x12   :  { %v46_v4 = vstv %s45_s0 }
  0x13   :  { %v47_v5 = vmul.f32 %v46_v4, %v40_v0  ;;  %v50_v6 = vstv %s162_s20 }
  0x14   :  { %v51_v8 = vmul.f32 %v50_v6, %v41_v1  ;;  %v54_v39 = vstv %s163_s21 }
  0x15   :  { %v48_v9 = vadd.f32 %v47_v5, %v44_v3  ;;  %v55_v40 = vmul.f32 %v54_v39, %v40_v0  ;;  %v58_v41 = vstv %s164_s22 }
  0x16   :  { %v59_v43 = vmul.f32 %v58_v41, %v41_v1 }
  0x17   :  { %v52_v11 = vadd.f32 %v51_v8, %v48_v9  ;;  %v56_v42 = vadd.f32 %v55_v40, %v44_v3 }
  0x19   :  { %v62_v13 = vadd.f32 %v61_v10, %v52_v11  ;;  %v60_v45 = vadd.f32 %v59_v43, %v56_v42 }
  0x1b   :  { %v64_v14 = vadd.f32 %v63_v12, %v62_v13 }
  0x1d   :  { %v165_v15 = vmul.f32 -1.442695, %v64_v14 }
  0x1f   :  { %176 = vpow2.f32 %v165_v15 }
  0x25   :  { %v177_v16 = vpop.eup %176 }
  0x26   :  { %v68_v17 = vadd.f32 1.0, %v177_v16 }
  0x28   :  { %178 = vrcp.f32 %v68_v17  ;;  %v80_v20 = vand.u32 2147483648, %v68_v17  ;;  %vm74_vm0 = vweird.f32 %v68_v17  ;;  %v78_v22 = vand.u32 2147483647, %v68_v17 }
  0x29   :  { %180 = vtanh.f32 %v64_v14 }
  0x2a   :  { %v81_v25 = vor.u32 1.1754944e-38, %v80_v20  ;;  %vm79_vm3 = vcmp.eq.f32.partialorder %v78_v22, 8.507059e+37 }
  0x2e   :  { %v179_v18 = vpop.eup %178 }
  0x2f   :  { %v70_v19 = vmul.f32 %v179_v18, %v68_v17  ;;  %vm75_vm1 = vweird.f32 %v179_v18  ;;  %v181_v23 = vpop.eup %180 }
  0x30   :  { %vm76_vm2 = vmor %vm74_vm0, %vm75_vm1  ;;  %v87_v27 = vrot.slane %v181_v23, 2 }
  0x31   :  { %v71_v21 = vsub.f32 1.0, %v70_v19 }
  0x33   :  { %v72_v24 = vmul.f32 %v179_v18, %v71_v21 }
  0x35   :  { %v73_v26 = vadd.f32 %v179_v18, %v72_v24 }
  0x37   :  { %v77_v28 = vsel %vm76_vm2, %v179_v18, %v73_v26 }
  0x38   :  { %v82_v29 = vsel %vm79_vm3, %v81_v25, %v77_v28 }
  0x39   :  { %v85_v30 = vmul.f32 0.0, %v82_v29  ;;  %v89_v31 = vmul.f32 %v87_v27, %v82_v29 }
  0x3b   :  { %v91_v32 = vrot.slane %v89_v31, 7 }
  0x3d   :  { %v93_v33 = vadd.f32 %v91_v32, %v85_v30 }
  0x3f   :  { %182 = vtanh.f32 %v93_v33 }
  0x45   :  { %v183_v34 = vpop.eup %182 }
  0x46   :  { %v96_v35 = vrot.slane %v183_v34, 6 }
  0x48   :  { %v98_v36 = vmul.f32 %v96_v35, %v82_v29 }
  0x4a   :  { %v100_v37 = vrot.slane %v98_v36, 3 }
  0x4c   :  { %106 = vrot.lane.b32.xlu0 %v100_v37, %s236_s1  ;;  %167 = vpush %v100_v37 }
  0x7d   :  { %s168_s23 = spop %167 }
  0x7e   :  { %v102_v44 = vstv %s168_s23 }
  0x7f   :  { %v104_v46 = vmul.f32 %v102_v44, %v42_v2 }
  0x81   :  { %v105_v47 = vadd.f32 %v104_v46, %v60_v45 }
  0xbe   :  { %v107_v38 = vpop.permute.xlu0 %106 }
  0xbf   :  { %169 = vpush %v107_v38 }
  0xf0   :  { %s170_s24 = spop %169 }
  0xf1   :  { %v109_v48 = vstv %s170_s24 }
  0xf2   :  { %v111_v49 = vmul.f32 %v109_v48, %v43_v7 }
  0xf4   :  { %v112_v50 = vadd.f32 %v111_v49, %v105_v47 }
  0xf6   :  { %v166_v51 = vmul.f32 -1.442695, %v112_v50 }
  0xf8   :  { %184 = vpow2.f32 %v166_v51 }
  0xfe   :  { %v185_v52 = vpop.eup %184 }
  0xff   :  { %v116_v53 = vadd.f32 1.0, %v185_v52 }
 0x101   :  { %186 = vrcp.f32 %v116_v53  ;;  %v128_v57 = vand.u32 2147483648, %v116_v53  ;;  %v126_v59 = vand.u32 2147483647, %v116_v53  ;;  %vm122_vm5 = vweird.f32 %v116_v53 }
 0x102   :  { %188 = vtanh.f32 %v112_v50 }
 0x103   :  { %v129_v62 = vor.u32 1.1754944e-38, %v128_v57  ;;  %vm127_vm7 = vcmp.eq.f32.partialorder %v126_v59, 8.507059e+37 }
 0x107   :  { %v187_v54 = vpop.eup %186 }
 0x108   :  { %v118_v55 = vmul.f32 %v187_v54, %v116_v53  ;;  %vm123_vm4 = vweird.f32 %v187_v54  ;;  %v189_v60 = vpop.eup %188 }
 0x109   :  { %vm124_vm6 = vmor %vm122_vm5, %vm123_vm4  ;;  %v135_v0 = vrot.slane %v189_v60, 2 }
 0x10a   :  { %v119_v56 = vsub.f32 1.0, %v118_v55 }
 0x10c   :  { %v120_v58 = vmul.f32 %v187_v54, %v119_v56 }
 0x10e   :  { %v121_v61 = vadd.f32 %v187_v54, %v120_v58 }
 0x110   :  { %v125_v63 = vsel %vm124_vm6, %v187_v54, %v121_v61 }
 0x111   :  { %v130_v1 = vsel %vm127_vm7, %v129_v62, %v125_v63 }
 0x112   :  { %v137_v2 = vmul.f32 %v135_v0, %v130_v1  ;;  %v133_v3 = vmul.f32 %v130_v1, %v93_v33 }
 0x114   :  { %v139_v4 = vrot.slane %v137_v2, 7 }
 0x116   :  { %v141_v5 = vadd.f32 %v139_v4, %v133_v3 }
 0x118   :  { %190 = vtanh.f32 %v141_v5 }
 0x11e   :  { %v191_v6 = vpop.eup %190 }
 0x11f   :  { %v144_v7 = vrot.slane %v191_v6, 6 }
 0x121   :  { %v146_v8 = vmul.f32 %v144_v7, %v130_v1 }
 0x123   :  { %v149_v9 = vrot.slane %v146_v8, 2 }
 0x125   :  { %v152_v10 = vsel %vm151_vm8, %v100_v37, %v149_v9 }
 0x126   :  { %v154_v11 = vsel %vm153_vm9, %v152_v10, 0.0 }
 0x127   :  { %155 = vst [vmem:[%s263_s2] sm:$0xff] %v154_v11 }
 0x128   :  { %160 = vsyncpa [#allocation3], 1 }
 0x129   :  { %161 = vsyncpa [#allocation4], 1 }

</bundles_post_ra>
